<compile_context>
chip_gen: v7x
topology: tpu7x:2x2x1
jax: 0.10.0
libtpu: 0.0.40
codegen_flags: <defaults>
</compile_context>

<pallas_src>
import jax
import jax.numpy as jnp
from jax.experimental import pallas as pl
from jax.experimental.pallas import tpu as pltpu


# ----------------------------- Pallas kernel ------------------------------- #
def _mlp_kernel(x_ref, w1_ref, b1_ref, w2_ref, b2_ref, w3_ref, b3_ref, o_ref):
    # x_ref:  (TB, 5, TN)   TB batches per step, channels on sublanes, tokens on lanes
    # w*_ref: (C_out, C_in)  transposed 1x1-conv weights (BN folded)
    # b*_ref: (C_out, 1)     biases, broadcast across the token/lane axis
    # o_ref:  (TB, F, TN)
    w1, b1 = w1_ref[...], b1_ref[...]
    w2, b2 = w2_ref[...], b2_ref[...]
    w3, b3 = w3_ref[...], b3_ref[...]
    tb = x_ref.shape[0]
    for b in range(tb):                       # static unroll over batches in the tile
        x = x_ref[b]                                                   # (5, TN)
        h = jnp.dot(w1, x, preferred_element_type=jnp.float32) + b1
        h = jnp.maximum(h, 0.0)                                        # ReLU
        h = jnp.dot(w2, h, preferred_element_type=jnp.float32) + b2
        h = jnp.maximum(h, 0.0)                                        # ReLU
        o = jnp.dot(w3, h, preferred_element_type=jnp.float32) + b3
        o_ref[b] = o.astype(o_ref.dtype)


def _run_mlp(x_bcn, params, tb, tn, out_dtype):
    """x_bcn: [B, 5, n_pad] f32 with n_pad % tn == 0, tn % 128 == 0, B % tb == 0.
    Returns [B, F, n_pad] in token-in-lane layout (no post-transpose needed)."""
    B, c_in, n_pad = x_bcn.shape
    w1, b1, w2, b2, w3, b3 = params
    f_out = w3.shape[0]
    full = lambda g, j: (0, 0)
    return pl.pallas_call(
        _mlp_kernel,
        out_shape=jax.ShapeDtypeStruct((B, f_out, n_pad), out_dtype),
        grid_spec=pltpu.PrefetchScalarGridSpec(
            num_scalar_prefetch=0,
            grid=(B // tb, n_pad // tn),
            in_specs=[
                pl.BlockSpec((tb, c_in, tn), lambda g, j: (g, 0, j)),
                pl.BlockSpec(w1.shape, full),
                pl.BlockSpec(b1.shape, full),
                pl.BlockSpec(w2.shape, full),
                pl.BlockSpec(b2.shape, full),
                pl.BlockSpec(w3.shape, full),
                pl.BlockSpec(b3.shape, full),
            ],
            out_specs=pl.BlockSpec((tb, f_out, tn), lambda g, j: (g, 0, j)),
        ),
        compiler_params=pltpu.CompilerParams(
            dimension_semantics=("parallel", "parallel"),
            vmem_limit_bytes=32 * 1024 * 1024,   # headroom over v5e's 16 MiB default
        ),
    )(x_bcn, w1, b1, w2, b2, w3, b3)


# --------------------------- Parameter building ----------------------------- #
def _fold_bn(w, b, gamma, beta, mean, var, eps=1e-5):
    """Fold eval-mode BatchNorm1d into the preceding 1x1 conv (w: [C_out, C_in])."""
    s = gamma / jnp.sqrt(var + eps)
    return w * s[:, None], b * s + (beta - mean * s)


def init_line_positional_encoder(key, feature_dim, layers):
    """Deterministic init mirroring nn.Conv1d default init + BN defaults.
    Returns folded params (w1, b1, w2, b2, w3, b3) with w as (C_out, C_in) and
    b as (C_out, 1) — the token-in-lane orientation the kernel consumes."""
    channels = [5] + list(layers) + [feature_dim]
    params = []
    keys = jax.random.split(key, 2 * (len(channels) - 1))
    for i in range(1, len(channels)):
        c_in, c_out = channels[i - 1], channels[i]
        bound = 1.0 / jnp.sqrt(float(c_in))
        w = jax.random.uniform(keys[2 * (i - 1)], (c_out, c_in), jnp.float32,
                               minval=-bound, maxval=bound)
        if i < len(channels) - 1:
            b = jax.random.uniform(keys[2 * (i - 1) + 1], (c_out,), jnp.float32,
                                   minval=-bound, maxval=bound)
            # BatchNorm1d defaults: gamma=1, beta=0, running_mean=0, running_var=1
            gamma = jnp.ones((c_out,), jnp.float32)
            beta = jnp.zeros((c_out,), jnp.float32)
            mean = jnp.zeros((c_out,), jnp.float32)
            var = jnp.ones((c_out,), jnp.float32)
            w, b = _fold_bn(w, b, gamma, beta, mean, var)
        else:
            # nn.init.constant_(self.encoder[-1].bias, 0.0)
            b = jnp.zeros((c_out,), jnp.float32)
        params.extend([w, b.reshape(c_out, 1)])
    return tuple(params)


# ------------------------------ Forward glue -------------------------------- #
def _round_up(x, m):
    return ((x + m - 1) // m) * m


def _largest_divisor_leq(b, cap):
    cap = max(1, min(b, cap))
    for d in range(cap, 0, -1):
        if b % d == 0:
            return d
    return 1


def _choose_tiling(B, N, max_tokens_per_step):
    """Pick (tb batches/step, tn tokens/step per batch, per-batch padded length)."""
    n128 = _round_up(N, 128)
    if n128 <= max_tokens_per_step:
        # Whole (padded) batch per tile; pack multiple batches per step.
        tn = n128
        n_pad = n128
        tb = _largest_divisor_leq(B, max_tokens_per_step // n128)
    else:
        # Split n128 into k near-equal 128-multiple tiles (pad waste <= ~k*128).
        k = -(-n128 // max_tokens_per_step)
        tn = _round_up(-(-n128 // k), 128)
        n_pad = k * tn
        tb = 1
    return tb, tn, n_pad


def line_positional_encoder(params, klines, responses, angles, feature_dim,
                            *, max_tokens_per_step=8192, out_dtype=jnp.float32):
    """klines [B,N,2,2], responses [B,N,1], angles [B,N,2] -> [B, feature_dim, N]."""
    B, N = klines.shape[0], klines.shape[1]
    mid_points = (klines[:, :, 0] + klines[:, :, 1]) * 0.5            # [B, N, 2]
    # Same concat the module performs (torch.cat along dim=1), in [B, 5, N]
    # layout so kernel loads/stores are lane-dense.
    x_bcn = jnp.concatenate(
        [jnp.transpose(mid_points, (0, 2, 1)),
         jnp.transpose(responses, (0, 2, 1)),
         jnp.transpose(angles, (0, 2, 1))], axis=1).astype(jnp.float32)  # [B,5,N]

    tb, tn, n_pad = _choose_tiling(B, N, max_tokens_per_step)
    if n_pad != N:
        x_bcn = jnp.pad(x_bcn, ((0, 0), (0, 0), (0, n_pad - N)))

    out = _run_mlp(x_bcn, params, tb, tn, out_dtype)                  # [B, F, n_pad]
    return out[:, :, :N]                                              # [B, F, N]


def _reference(params, klines, responses, angles):
    """Plain-JAX mirror of the PyTorch module (eval mode, BN folded)."""
    w1, b1, w2, b2, w3, b3 = params
    hp = jax.lax.Precision.HIGHEST
    mid = (klines[:, :, 0] + klines[:, :, 1]) * 0.5
    x = jnp.concatenate(
        [jnp.transpose(mid, (0, 2, 1)),
         jnp.transpose(responses, (0, 2, 1)),
         jnp.transpose(angles, (0, 2, 1))], axis=1).astype(jnp.float32)
    h = jnp.maximum(jnp.einsum('oc,bcn->bon', w1, x, precision=hp) + b1[None], 0.0)
    h = jnp.maximum(jnp.einsum('oc,bcn->bon', w2, h, precision=hp) + b2[None], 0.0)
    return jnp.einsum('oc,bcn->bon', w3, h, precision=hp) + b3[None]


# ---------------------------------- Main ------------------------------------ #
if __name__ == "__main__":
    feature_dim = 32
    layers = [32, 64]          # MLP channels: [5, 32, 64, 32]

    key = jax.random.PRNGKey(0)
    k_par, k_kl, k_rs, k_an = jax.random.split(key, 4)
    params = init_line_positional_encoder(k_par, feature_dim, layers)

    # Case 1: B=2, N=200 -> n128=256, tb=2 (both batches in one 512-token step).
    B, N = 2, 200
    klines = jax.random.normal(k_kl, (B, N, 2, 2), jnp.float32)
    responses = jax.random.uniform(k_rs, (B, N, 1), jnp.float32)
    angles = jax.random.normal(k_an, (B, N, 2), jnp.float32)

    out = line_positional_encoder(params, klines, responses, angles, feature_dim)
    out = jax.block_until_ready(out)
    ref = _reference(params, klines, responses, angles)
    assert out.shape == (B, feature_dim, N), out.shape
    assert jnp.allclose(out, ref, atol=1e-4, rtol=1e-4), float(
        jnp.max(jnp.abs(out - ref)))

    # bf16-output storage path (the v6e/v7x HBM-traffic optimization).
    out_bf16 = line_positional_encoder(params, klines, responses, angles,
                                       feature_dim, out_dtype=jnp.bfloat16)
    out_bf16 = jax.block_until_ready(out_bf16)
    assert out_bf16.dtype == jnp.bfloat16
    assert jnp.allclose(out_bf16.astype(jnp.float32), ref, atol=5e-2, rtol=5e-2), float(
        jnp.max(jnp.abs(out_bf16.astype(jnp.float32) - ref)))

    # Case 2: odd batch count exercises the batches-per-step divisor logic (tb=3).
    B2, N2 = 3, 130
    kl2 = jax.random.normal(k_kl, (B2, N2, 2, 2), jnp.float32)
    rs2 = jax.random.uniform(k_rs, (B2, N2, 1), jnp.float32)
    an2 = jax.random.normal(k_an, (B2, N2, 2), jnp.float32)
    out2 = jax.block_until_ready(
        line_positional_encoder(params, kl2, rs2, an2, feature_dim))
    ref2 = _reference(params, kl2, rs2, an2)
    assert out2.shape == (B2, feature_dim, N2), out2.shape
    assert jnp.allclose(out2, ref2, atol=1e-4, rtol=1e-4), float(
        jnp.max(jnp.abs(out2 - ref2)))

    print("KERNEL_OK")
</pallas_src>

<mosaic_0001>
module attributes {stable_mosaic.version = 11 : i64} {
  func.func @_mlp_kernel(%arg0: i32, %arg1: i32, %arg2: memref<2x5x256xf32, #tpu.memory_space<vmem>>, %arg3: memref<32x5xf32, #tpu.memory_space<vmem>>, %arg4: memref<32x1xf32, #tpu.memory_space<vmem>>, %arg5: memref<64x32xf32, #tpu.memory_space<vmem>>, %arg6: memref<64x1xf32, #tpu.memory_space<vmem>>, %arg7: memref<32x64xf32, #tpu.memory_space<vmem>>, %arg8: memref<32x1xf32, #tpu.memory_space<vmem>>, %arg9: memref<2x32x256xf32, #tpu.memory_space<vmem>>) attributes {dimension_semantics = [#tpu.dimension_semantics<parallel>, #tpu.dimension_semantics<parallel>], iteration_bounds = array<i64: 1, 1>, scalar_prefetch = 0 : i64, scratch_operands = 0 : i64, tpu.core_type = #tpu.core_type<tc>, window_params = [{transform_indices = @transform_0, window_bounds = array<i64: 2, 5, 256>}, {pipeline_mode = #tpu.pipeline_mode<synchronous>, transform_indices = @transform_1, window_bounds = array<i64: 32, 5>}, {pipeline_mode = #tpu.pipeline_mode<synchronous>, transform_indices = @transform_2, window_bounds = array<i64: 32, 1>}, {pipeline_mode = #tpu.pipeline_mode<synchronous>, transform_indices = @transform_3, window_bounds = array<i64: 64, 32>}, {pipeline_mode = #tpu.pipeline_mode<synchronous>, transform_indices = @transform_4, window_bounds = array<i64: 64, 1>}, {pipeline_mode = #tpu.pipeline_mode<synchronous>, transform_indices = @transform_5, window_bounds = array<i64: 32, 64>}, {pipeline_mode = #tpu.pipeline_mode<synchronous>, transform_indices = @transform_6, window_bounds = array<i64: 32, 1>}, {transform_indices = @transform_7, window_bounds = array<i64: 2, 32, 256>}]} {
    %c0 = arith.constant 0 : index
    %c0_0 = arith.constant 0 : index
    %0 = vector.load %arg3[%c0, %c0_0] : memref<32x5xf32, #tpu.memory_space<vmem>>, vector<32x5xf32>
    %c0_1 = arith.constant 0 : index
    %c0_2 = arith.constant 0 : index
    %1 = vector.load %arg4[%c0_1, %c0_2] : memref<32x1xf32, #tpu.memory_space<vmem>>, vector<32x1xf32>
    %c0_3 = arith.constant 0 : index
    %c0_4 = arith.constant 0 : index
    %2 = vector.load %arg5[%c0_3, %c0_4] : memref<64x32xf32, #tpu.memory_space<vmem>>, vector<64x32xf32>
    %c0_5 = arith.constant 0 : index
    %c0_6 = arith.constant 0 : index
    %3 = vector.load %arg6[%c0_5, %c0_6] : memref<64x1xf32, #tpu.memory_space<vmem>>, vector<64x1xf32>
    %c0_7 = arith.constant 0 : index
    %c0_8 = arith.constant 0 : index
    %4 = vector.load %arg7[%c0_7, %c0_8] : memref<32x64xf32, #tpu.memory_space<vmem>>, vector<32x64xf32>
    %c0_9 = arith.constant 0 : index
    %c0_10 = arith.constant 0 : index
    %5 = vector.load %arg8[%c0_9, %c0_10] : memref<32x1xf32, #tpu.memory_space<vmem>>, vector<32x1xf32>
    %c0_11 = arith.constant 0 : index
    %c0_12 = arith.constant 0 : index
    %c0_13 = arith.constant 0 : index
    %6 = vector.load %arg2[%c0_11, %c0_12, %c0_13] : memref<2x5x256xf32, #tpu.memory_space<vmem>>, vector<1x5x256xf32>
    %7 = vector.shape_cast %6 : vector<1x5x256xf32> to vector<5x256xf32>
    %cst = arith.constant dense<0.000000e+00> : vector<32x256xf32>
    %8 = tpu.matmul %0, %7, %cst {dimension_numbers = #tpu.dot_dimension_numbers<[1], [0], [0], [1], [0, 0, 1, 1], [], []>} : vector<32x5xf32>, vector<5x256xf32>, vector<32x256xf32> -> vector<32x256xf32>
    %9 = vector.broadcast %1 : vector<32x1xf32> to vector<32x256xf32>
    %10 = arith.addf %8, %9 : vector<32x256xf32>
    %cst_14 = arith.constant 0.000000e+00 : f32
    %11 = vector.broadcast %cst_14 : f32 to vector<32x256xf32>
    %12 = arith.maximumf %10, %11 : vector<32x256xf32>
    %cst_15 = arith.constant dense<0.000000e+00> : vector<64x256xf32>
    %13 = tpu.matmul %2, %12, %cst_15 {dimension_numbers = #tpu.dot_dimension_numbers<[1], [0], [0], [1], [0, 0, 1, 1], [], []>} : vector<64x32xf32>, vector<32x256xf32>, vector<64x256xf32> -> vector<64x256xf32>
    %14 = vector.broadcast %3 : vector<64x1xf32> to vector<64x256xf32>
    %15 = arith.addf %13, %14 : vector<64x256xf32>
    %cst_16 = arith.constant 0.000000e+00 : f32
    %16 = vector.broadcast %cst_16 : f32 to vector<64x256xf32>
    %17 = arith.maximumf %15, %16 : vector<64x256xf32>
    %cst_17 = arith.constant dense<0.000000e+00> : vector<32x256xf32>
    %18 = tpu.matmul %4, %17, %cst_17 {dimension_numbers = #tpu.dot_dimension_numbers<[1], [0], [0], [1], [0, 0, 1, 1], [], []>} : vector<32x64xf32>, vector<64x256xf32>, vector<32x256xf32> -> vector<32x256xf32>
    %19 = vector.broadcast %5 : vector<32x1xf32> to vector<32x256xf32>
    %20 = arith.addf %18, %19 : vector<32x256xf32>
    %c0_18 = arith.constant 0 : index
    %c0_19 = arith.constant 0 : index
    %c0_20 = arith.constant 0 : index
    %21 = vector.load %arg9[%c0_18, %c0_19, %c0_20] : memref<2x32x256xf32, #tpu.memory_space<vmem>>, vector<1x32x256xf32>
    %22 = vector.shape_cast %21 : vector<1x32x256xf32> to vector<32x256xf32>
    %23 = vector.shape_cast %20 : vector<32x256xf32> to vector<1x32x256xf32>
    tpu.vector_store %arg9[%c0_18, %c0_19, %c0_20], %23 {strides = array<i32>} : memref<2x32x256xf32, #tpu.memory_space<vmem>>, vector<1x32x256xf32>,
    %c1 = arith.constant 1 : index
    %c0_21 = arith.constant 0 : index
    %c0_22 = arith.constant 0 : index
    %24 = vector.load %arg2[%c1, %c0_21, %c0_22] : memref<2x5x256xf32, #tpu.memory_space<vmem>>, vector<1x5x256xf32>
    %25 = vector.shape_cast %24 : vector<1x5x256xf32> to vector<5x256xf32>
    %cst_23 = arith.constant dense<0.000000e+00> : vector<32x256xf32>
    %26 = tpu.matmul %0, %25, %cst_23 {dimension_numbers = #tpu.dot_dimension_numbers<[1], [0], [0], [1], [0, 0, 1, 1], [], []>} : vector<32x5xf32>, vector<5x256xf32>, vector<32x256xf32> -> vector<32x256xf32>
    %27 = vector.broadcast %1 : vector<32x1xf32> to vector<32x256xf32>
    %28 = arith.addf %26, %27 : vector<32x256xf32>
    %cst_24 = arith.constant 0.000000e+00 : f32
    %29 = vector.broadcast %cst_24 : f32 to vector<32x256xf32>
    %30 = arith.maximumf %28, %29 : vector<32x256xf32>
    %cst_25 = arith.constant dense<0.000000e+00> : vector<64x256xf32>
    %31 = tpu.matmul %2, %30, %cst_25 {dimension_numbers = #tpu.dot_dimension_numbers<[1], [0], [0], [1], [0, 0, 1, 1], [], []>} : vector<64x32xf32>, vector<32x256xf32>, vector<64x256xf32> -> vector<64x256xf32>
    %32 = vector.broadcast %3 : vector<64x1xf32> to vector<64x256xf32>
    %33 = arith.addf %31, %32 : vector<64x256xf32>
    %cst_26 = arith.constant 0.000000e+00 : f32
    %34 = vector.broadcast %cst_26 : f32 to vector<64x256xf32>
    %35 = arith.maximumf %33, %34 : vector<64x256xf32>
    %cst_27 = arith.constant dense<0.000000e+00> : vector<32x256xf32>
    %36 = tpu.matmul %4, %35, %cst_27 {dimension_numbers = #tpu.dot_dimension_numbers<[1], [0], [0], [1], [0, 0, 1, 1], [], []>} : vector<32x64xf32>, vector<64x256xf32>, vector<32x256xf32> -> vector<32x256xf32>
    %37 = vector.broadcast %5 : vector<32x1xf32> to vector<32x256xf32>
    %38 = arith.addf %36, %37 : vector<32x256xf32>
    %c1_28 = arith.constant 1 : index
    %c0_29 = arith.constant 0 : index
    %c0_30 = arith.constant 0 : index
    %39 = vector.load %arg9[%c1_28, %c0_29, %c0_30] : memref<2x32x256xf32, #tpu.memory_space<vmem>>, vector<1x32x256xf32>
    %40 = vector.shape_cast %39 : vector<1x32x256xf32> to vector<32x256xf32>
    %41 = vector.shape_cast %38 : vector<32x256xf32> to vector<1x32x256xf32>
    tpu.vector_store %arg9[%c1_28, %c0_29, %c0_30], %41 {strides = array<i32>} : memref<2x32x256xf32, #tpu.memory_space<vmem>>, vector<1x32x256xf32>,
    return
  }
  func.func @transform_0(%arg0: i32, %arg1: i32) -> (i32, i32, i32) {
    %c0_i32 = arith.constant 0 : i32
    %c0_i32_0 = arith.constant 0 : i32
    return %arg0, %c0_i32, %arg1 : i32, i32, i32
  }
  func.func @transform_1(%arg0: i32, %arg1: i32) -> (i32, i32) {
    %c0_i32 = arith.constant 0 : i32
    %c0_i32_0 = arith.constant 0 : i32
    %c0_i32_1 = arith.constant 0 : i32
    return %c0_i32, %c0_i32_0 : i32, i32
  }
  func.func @transform_2(%arg0: i32, %arg1: i32) -> (i32, i32) {
    %c0_i32 = arith.constant 0 : i32
    %c0_i32_0 = arith.constant 0 : i32
    %c0_i32_1 = arith.constant 0 : i32
    return %c0_i32, %c0_i32_0 : i32, i32
  }
  func.func @transform_3(%arg0: i32, %arg1: i32) -> (i32, i32) {
    %c0_i32 = arith.constant 0 : i32
    %c0_i32_0 = arith.constant 0 : i32
    %c0_i32_1 = arith.constant 0 : i32
    return %c0_i32, %c0_i32_0 : i32, i32
  }
  func.func @transform_4(%arg0: i32, %arg1: i32) -> (i32, i32) {
    %c0_i32 = arith.constant 0 : i32
    %c0_i32_0 = arith.constant 0 : i32
    %c0_i32_1 = arith.constant 0 : i32
    return %c0_i32, %c0_i32_0 : i32, i32
  }
  func.func @transform_5(%arg0: i32, %arg1: i32) -> (i32, i32) {
    %c0_i32 = arith.constant 0 : i32
    %c0_i32_0 = arith.constant 0 : i32
    %c0_i32_1 = arith.constant 0 : i32
    return %c0_i32, %c0_i32_0 : i32, i32
  }
  func.func @transform_6(%arg0: i32, %arg1: i32) -> (i32, i32) {
    %c0_i32 = arith.constant 0 : i32
    %c0_i32_0 = arith.constant 0 : i32
    %c0_i32_1 = arith.constant 0 : i32
    return %c0_i32, %c0_i32_0 : i32, i32
  }
  func.func @transform_7(%arg0: i32, %arg1: i32) -> (i32, i32, i32) {
    %c0_i32 = arith.constant 0 : i32
    %c0_i32_0 = arith.constant 0 : i32
    return %arg0, %c0_i32, %arg1 : i32, i32, i32
  }
}

</mosaic_0001>

<bundles_post_ra>
// kernel: tpu_custom_call.1
= control target key start
LH: loop header
LB: loop body
LE: loop exit
PB: predicated region body
PF: predicated region fallthrough
CT: control target
= control target key end

     0   :  { %vm94_vm0 = vcmask 1044480   ;;  %v988_v2 = vmov 0.0   ;;  %vm81_vm1 = vcmask 39936   ;;  %v989_v4 = vmov 0   ;;  %s1381_s0 = inlined_call_operand.vmem [shape: f32[2,5,256], index: 0, kind: input, shape index: {}]   ;;  %s1382_s1 = inlined_call_operand.vmem [shape: f32[32,5], index: 1, kind: input, shape index: {}]   ;;  %s1383_s2 = inlined_call_operand.vmem [shape: f32[32,1], index: 2, kind: input, shape index: {}]   ;;  %s1384_s3 = inlined_call_operand.vmem [shape: f32[64,32], index: 3, kind: input, shape index: {}]   ;;  %s1385_s4 = inlined_call_operand.vmem [shape: f32[64,1], index: 4, kind: input, shape index: {}]   ;;  %s1386_s5 = inlined_call_operand.vmem [shape: f32[32,64], index: 5, kind: input, shape index: {}]   ;;  %s1387_s6 = inlined_call_operand.vmem [shape: f32[32,1], index: 6, kind: input, shape index: {}]   ;;  %s1388_s7 = inlined_call_operand.hbm [shape: f32[2,32,256], index: 7, kind: output, shape index: {}]  }
   0x1   :  { %v60_v0 = vld [vmem:[%s1381_s0 + $0x8] sm:$0x1f]  ;;  %v59_v1 = vld [vmem:[%s1381_s0] sm:$0x1f]  ;;  %165 = vmatprep.mubr.f32.mxu0 %v988_v2  ;;  %962 = vset.pattern.permute.xlu0 %v989_v4  ;;  %v33_v6 = vld [vmem:[%s1383_s2 + $0x10] sm:$0xff] }
   0x2   :  { %871 = vmatprep.subr.msk.mxu0 %vm94_vm0, %v60_v0  ;;  %v1044_v3 = vld [vmem:[%s1382_s1] sm:$0xff]  ;;  %v1059_v7 = vld [vmem:[%s1382_s1 + $0x8] sm:$0xff]  ;;  %963 = vset.pattern.permute.xlu1 %v989_v4  ;;  %v34_v9 = vld [vmem:[%s1383_s2 + $0x18] sm:$0xff] }
   0x3   :  { %872 = vmatpush1.msk.msra.mxu0 %vm94_vm0, %v59_v1  ;;  %v31_v5 = vld [vmem:[%s1383_s2] sm:$0xff]  ;;  %v32_v8 = vld [vmem:[%s1383_s2 + $0x8] sm:$0xff]  ;;  %73 = vperm.xlu1 %963, %v33_v6  }
   0x4   :  { %873 = vmatmul.mubr.msk.f32.vlgmr.msra.gmra.mrb[0].mxu0 %vm81_vm1, %v1044_v3  ;;  %63 = vperm.xlu0 %962, %v31_v5  }
   0x5   :  { %171 = vmatprep.mubr.f32.mxu0 %v988_v2  ;;  %327 = vmatprep.mubr.f32.mxu1 %v988_v2 }
   0x8   :  { %874 = vmatmul.mubr.msk.f32.gmra.mrb[2].mxu0 %vm81_vm1, %v1059_v7  ;;  %68 = vperm.xlu0 %962, %v32_v8  }
   0x9   :  { %12 = vsyncpa [#allocation3], 0  ;;  %177 = vmatprep.mubr.f32.mxu0 %v988_v2  ;;  %v1074_v10 = vld [vmem:[%s1382_s1 + $0x10] sm:$0xff]  ;;  %v43_v11 = vld [vmem:[%s1385_s4] sm:$0xff]  ;;  %78 = vperm.xlu1 %963, %v34_v9   ;;  %vm238_vm2 = vcmask 261120   ;;  %vm412_vm3 = vcmask 523264  }
   0xa   :  { %v44_v12 = vld [vmem:[%s1385_s4 + $0x8] sm:$0xff]  ;;  %v1088_v13 = vld [vmem:[%s1382_s1 + $0x18] sm:$0xff]  ;;  %v45_v14 = vld [vmem:[%s1385_s4 + $0x10] sm:$0xff] }
   0xb   :  { %v46_v15 = vld [vmem:[%s1385_s4 + $0x18] sm:$0xff]  ;;  %v47_v16 = vld [vmem:[%s1385_s4 + $0x20] sm:$0xff]  ;;  %v48_v17 = vld [vmem:[%s1385_s4 + $0x28] sm:$0xff] }
   0xc   :  { %875 = vmatmul.mubr.msk.f32.gmra.mrb[4].mxu0 %vm81_vm1, %v1074_v10  ;;  %200 = vperm.xlu0 %962, %v43_v11   ;;  %v49_v18 = vld [vmem:[%s1385_s4 + $0x30] sm:$0xff]  ;;  %v50_v19 = vld [vmem:[%s1385_s4 + $0x38] sm:$0xff]  ;;  %v55_v20 = vld [vmem:[%s1387_s6] sm:$0xff] }
   0xd   :  { %183 = vmatprep.mubr.f32.mxu0 %v988_v2  ;;  %205 = vperm.xlu1 %963, %v44_v12   ;;  %v56_v21 = vld [vmem:[%s1387_s6 + $0x8] sm:$0xff]  ;;  %v57_v22 = vld [vmem:[%s1387_s6 + $0x10] sm:$0xff]  ;;  %v58_v23 = vld [vmem:[%s1387_s6 + $0x18] sm:$0xff] }
   0xe   :  { %v1142_v56 = vld [vmem:[%s1384_s3] sm:$0xff]  ;;  %v1150_v57 = vld [vmem:[%s1384_s3 + $0x8] sm:$0xff]  ;;  %v1158_v58 = vld [vmem:[%s1384_s3 + $0x10] sm:$0xff] }
   0xf   :  { %v1166_v59 = vld [vmem:[%s1384_s3 + $0x18] sm:$0xff]  ;;  %v1174_v60 = vld [vmem:[%s1384_s3 + $0x20] sm:$0xff]  ;;  %v1182_v61 = vld [vmem:[%s1384_s3 + $0x28] sm:$0xff] }
  0x10   :  { %876 = vmatmul.mubr.msk.f32.gmra.mrb[6].mxu0 %vm81_vm1, %v1088_v13  ;;  %210 = vperm.xlu0 %962, %v45_v14   ;;  %v1190_v62 = vld [vmem:[%s1384_s3 + $0x30] sm:$0xff]  ;;  %v1198_v63 = vld [vmem:[%s1384_s3 + $0x38] sm:$0xff] }
  0x11   :  { %489 = vmatprep.mubr.f32.mxu0 %v988_v2  ;;  %215 = vperm.xlu1 %963, %v46_v15  }
  0x14   :  { %220 = vperm.xlu0 %962, %v47_v16  }
  0x15   :  { %225 = vperm.xlu1 %963, %v48_v17  }
  0x18   :  { %230 = vperm.xlu0 %962, %v49_v18  }
  0x19   :  { %235 = vperm.xlu1 %963, %v50_v19  }
  0x1c   :  { %394 = vperm.xlu0 %962, %v55_v20  }
  0x1d   :  { %399 = vperm.xlu1 %963, %v56_v21  }
  0x20   :  { %404 = vperm.xlu0 %962, %v57_v22  }
  0x21   :  { %409 = vperm.xlu1 %963, %v58_v23  }
  0x82   :  { %v1130_v33 = vpop.permute.xlu1 %73 }
  0x83   :  { %v1123_v24 = vpop.permute.xlu0 %63 }
  0x87   :  { %v1126_v28 = vpop.permute.xlu0 %68 }
  0x88   :  { %v1134_v44 = vpop.permute.xlu1 %78 }
  0x8b   :  { %v1203_v4 = vpop.permute.xlu0 %200 }
  0x8c   :  { %v1206_v6 = vpop.permute.xlu1 %205 }
  0x8f   :  { %v1211_v22 = vpop.permute.xlu0 %210 }
  0xd7   :  { %v167_v25 = vpop.f32.mrb[0].mxu0 }
  0xd8   :  { %v169_v26 = vpop.f32.mrb[1].mxu0  ;;  %v168_v27 = vadd.f32 %v167_v25, %v1123_v24 }
  0xd9   :  { %v170_v29 = vadd.f32 %v169_v26, %v1123_v24  ;;  %v1214_v26 = vpop.permute.xlu1 %215 }
  0xda   :  { %v190_v35 = vmax.f32 %v168_v27, 0.0 }
  0xdb   :  { %v173_v30 = vpop.f32.mrb[2].mxu0  ;;  %v191_v37 = vmax.f32 %v170_v29, 0.0 }
  0xdc   :  { %v174_v31 = vadd.f32 %v173_v30, %v1126_v28  ;;  %v175_v32 = vpop.f32.mrb[3].mxu0 }
  0xdd   :  { %v176_v34 = vadd.f32 %v175_v32, %v1126_v28 }
  0xde   :  { %v192_v36 = vmax.f32 %v174_v31, 0.0 }
  0xdf   :  { %v193_v38 = vmax.f32 %v176_v34, 0.0  ;;  %v179_v39 = vpop.f32.mrb[4].mxu0 }
  0xe0   :  { %v181_v40 = vpop.f32.mrb[5].mxu0  ;;  %v911_v41 = vpack.c.bf16 %v192_v36, %v190_v35  ;;  %v180_v43 = vadd.f32 %v179_v39, %v1130_v33 }
  0xe1   :  { %v909_v42 = vpack.c.bf16 %v193_v38, %v191_v37  ;;  %v182_v45 = vadd.f32 %v181_v40, %v1130_v33 }
  0xe2   :  { %v194_v50 = vmax.f32 %v180_v43, 0.0 }
  0xe3   :  { %v185_v46 = vpop.f32.mrb[6].mxu0  ;;  %910 = vmatprep.subr.bf16.mxu1 %v909_v42  ;;  %v195_v52 = vmax.f32 %v182_v45, 0.0  ;;  %v1222_v45 = vpop.permute.xlu1 %225 }
  0xe4   :  { %v186_v47 = vadd.f32 %v185_v46, %v1134_v44  ;;  %v187_v48 = vpop.f32.mrb[7].mxu0  ;;  %912 = vmatpush1.bf16.msra.mxu1 %v911_v41  ;;  %v1219_v41 = vpop.permute.xlu0 %220 }
  0xe5   :  { %v188_v49 = vadd.f32 %v187_v48, %v1134_v44 }
  0xe6   :  { %v196_v51 = vmax.f32 %v186_v47, 0.0 }
  0xe7   :  { %v197_v53 = vmax.f32 %v188_v49, 0.0 }
  0xe8   :  { %v915_v54 = vpack.c.bf16 %v196_v51, %v194_v50 }
  0xe9   :  { %v913_v55 = vpack.c.bf16 %v197_v53, %v195_v52 }
  0xeb   :  { %914 = vmatprep.subr.bf16.mxu1 %v913_v55 }
  0xec   :  { %916 = vmatpush1.bf16.msra.mxu1 %v915_v54 }
  0xef   :  { %877 = vmatmul.mubr.msk.f32.vlgmr.msra.gmra.mrb[0].mxu1 %vm238_vm2, %v1142_v56 }
  0xf0   :  { %333 = vmatprep.mubr.f32.mxu1 %v988_v2 }
  0xf3   :  { %878 = vmatmul.mubr.msk.f32.gmra.mrb[2].mxu1 %vm238_vm2, %v1150_v57 }
  0xf4   :  { %339 = vmatprep.mubr.f32.mxu1 %v988_v2 }
  0xf7   :  { %879 = vmatmul.mubr.msk.f32.gmra.mrb[4].mxu1 %vm238_vm2, %v1158_v58 }
  0xf8   :  { %345 = vmatprep.mubr.f32.mxu1 %v988_v2 }
  0xfb   :  { %880 = vmatmul.mubr.msk.f32.gmra.mrb[6].mxu1 %vm238_vm2, %v1166_v59 }
  0xfc   :  { %351 = vmatprep.mubr.f32.mxu1 %v988_v2 }
  0xff   :  { %881 = vmatmul.mubr.msk.f32.gmra.mrb[8].mxu1 %vm238_vm2, %v1174_v60 }
 0x100   :  { %357 = vmatprep.mubr.f32.mxu1 %v988_v2 }
 0x103   :  { %882 = vmatmul.mubr.msk.f32.gmra.mrb[10].mxu1 %vm238_vm2, %v1182_v61 }
 0x104   :  { %363 = vmatprep.mubr.f32.mxu1 %v988_v2 }
 0x107   :  { %883 = vmatmul.mubr.msk.f32.gmra.mrb[12].mxu1 %vm238_vm2, %v1190_v62 }
 0x108   :  { %369 = vmatprep.mubr.f32.mxu1 %v988_v2 }
 0x10b   :  { %884 = vmatmul.mubr.msk.f32.gmra.mrb[14].mxu1 %vm238_vm2, %v1198_v63 }
 0x10c   :  { %692 = vmatprep.mubr.f32.mxu1 %v988_v2 }
 0x1c2   :  { %v329_v0 = vpop.f32.mrb[0].mxu1 }
 0x1c3   :  { %v331_v1 = vpop.f32.mrb[1].mxu1  ;;  %v330_v5 = vadd.f32 %v329_v0, %v1203_v4 }
 0x1c4   :  { %v332_v8 = vadd.f32 %v331_v1, %v1203_v4 }
 0x1c5   :  { %v376_v15 = vmax.f32 %v330_v5, 0.0  ;;  %v1227_v5 = vpop.permute.xlu0 %230 }
 0x1c6   :  { %v335_v9 = vpop.f32.mrb[2].mxu1  ;;  %v377_v17 = vmax.f32 %v332_v8, 0.0 }
 0x1c7   :  { %v336_v11 = vadd.f32 %v335_v9, %v1206_v6  ;;  %v337_v12 = vpop.f32.mrb[3].mxu1 }
 0x1c8   :  { %v338_v14 = vadd.f32 %v337_v12, %v1206_v6 }
 0x1c9   :  { %v378_v16 = vmax.f32 %v336_v11, 0.0  ;;  %v1230_v11 = vpop.permute.xlu1 %235 }
 0x1ca   :  { %v379_v18 = vmax.f32 %v338_v14, 0.0  ;;  %v341_v19 = vpop.f32.mrb[4].mxu1 }
 0x1cb   :  { %v919_v20 = vpack.c.bf16 %v378_v16, %v376_v15  ;;  %v343_v21 = vpop.f32.mrb[5].mxu1  ;;  %v342_v25 = vadd.f32 %v341_v19, %v1211_v22 }
 0x1cc   :  { %v917_v23 = vpack.c.bf16 %v379_v18, %v377_v17  ;;  %v344_v27 = vadd.f32 %v343_v21, %v1211_v22 }
 0x1cd   :  { %v380_v34 = vmax.f32 %v342_v25, 0.0 }
 0x1ce   :  { %v347_v29 = vpop.f32.mrb[6].mxu1  ;;  %918 = vmatprep.subr.bf16.mxu0 %v917_v23  ;;  %v381_v36 = vmax.f32 %v344_v27, 0.0  ;;  %v890_v27 = vld [vmem:[%s1381_s0 + $0x18] sm:$0x1f] }
 0x1cf   :  { %v348_v30 = vadd.f32 %v347_v29, %v1214_v26  ;;  %v349_v31 = vpop.f32.mrb[7].mxu1  ;;  %920 = vmatpush1.bf16.msra.mxu0 %v919_v20  ;;  %v1241_v29 = vld [vmem:[%s1386_s5] sm:$0xff] }
 0x1d0   :  { %v350_v32 = vadd.f32 %v349_v31, %v1214_v26  ;;  %v1253_v31 = vld [vmem:[%s1386_s5 + $0x8] sm:$0xff] }
 0x1d1   :  { %v382_v35 = vmax.f32 %v348_v30, 0.0  ;;  %v889_v30 = vld [vmem:[%s1381_s0 + $0x10] sm:$0x1f] }
 0x1d2   :  { %v383_v37 = vmax.f32 %v350_v32, 0.0  ;;  %v353_v38 = vpop.f32.mrb[8].mxu1  ;;  %v1262_v32 = vld [vmem:[%s1386_s5 + $0x10] sm:$0xff] }
 0x1d3   :  { %v923_v39 = vpack.c.bf16 %v382_v35, %v380_v34  ;;  %v355_v40 = vpop.f32.mrb[9].mxu1  ;;  %v354_v43 = vadd.f32 %v353_v38, %v1219_v41  ;;  %v1270_v34 = vld [vmem:[%s1386_s5 + $0x18] sm:$0xff]  ;;  %v1287_v35 = vpop.permute.xlu0 %394  ;;  %s990_s5 = smov [#allocation2]  }
 0x1d4   :  { %v921_v42 = vpack.c.bf16 %v383_v37, %v381_v36  ;;  %v356_v46 = vadd.f32 %v355_v40, %v1219_v41  ;;  %v1291_v38 = vpop.permute.xlu1 %399  ;;  %s860_s19 = sshll.u32 %s990_s5, 4  ;;  %s861_s19 = int_to_ptr.vmem [resolvable:$true] %s860_s19 }
 0x1d5   :  { %v384_v51 = vmax.f32 %v354_v43, 0.0  ;;  %s964_s4 = scalar_lea.vmem %s861_s19, 2048  ;;  %p969_p1 = scmp.lt.s32.totalorder %s861_s19, %s861_s19 }
 0x1d6   :  { %v359_v47 = vpop.f32.mrb[10].mxu1  ;;  %922 = vmatprep.subr.bf16.mxu0 %v921_v42  ;;  %v385_v53 = vmax.f32 %v356_v46, 0.0  ;;  %p965_p0 = scmp.ne.s32.totalorder %s861_s19, %s964_s4  ;;  %p970_p2 = scmp.lt.s32.totalorder %s964_s4, %s964_s4 }
 0x1d7   :  { %v360_v48 = vadd.f32 %v359_v47, %v1222_v45  ;;  %v361_v49 = vpop.f32.mrb[11].mxu1  ;;  %924 = vmatpush1.bf16.msra.mxu0 %v923_v39  ;;  %v1295_v42 = vpop.permute.xlu0 %404 }
 0x1d8   :  { %v362_v50 = vadd.f32 %v361_v49, %v1222_v45  ;;  %v1299_v49 = vpop.permute.xlu1 %409  ;;  %p971_p3 = por %p970_p2, %p969_p1 }
 0x1d9   :  { %v386_v52 = vmax.f32 %v360_v48, 0.0 }
 0x1da   :  { %v387_v54 = vmax.f32 %v362_v50, 0.0  ;;  %v365_v55 = vpop.f32.mrb[12].mxu1  ;;  %p972_p4 = pnand %p971_p3, %p965_p0 }
 0x1db   :  { %v927_v0 = vpack.c.bf16 %v386_v52, %v384_v51  ;;  %v367_v1 = vpop.f32.mrb[13].mxu1  ;;  %v366_v9 = vadd.f32 %v365_v55, %v1227_v5 }
 0x1dc   :  { %v925_v8 = vpack.c.bf16 %v387_v54, %v385_v53  ;;  %v368_v12 = vadd.f32 %v367_v1, %v1227_v5 }
 0x1dd   :  { %v388_v18 = vmax.f32 %v366_v9, 0.0 }
 0x1de   :  { %v371_v14 = vpop.f32.mrb[14].mxu1  ;;  %926 = vmatprep.subr.bf16.mxu0 %v925_v8  ;;  %v389_v20 = vmax.f32 %v368_v12, 0.0 }
 0x1df   :  { %v372_v15 = vadd.f32 %v371_v14, %v1230_v11  ;;  %v373_v16 = vpop.f32.mrb[15].mxu1  ;;  %928 = vmatpush1.bf16.msra.mxu0 %v927_v0 }
 0x1e0   :  { %v374_v17 = vadd.f32 %v373_v16, %v1230_v11 }
 0x1e1   :  { %v390_v19 = vmax.f32 %v372_v15, 0.0 }
 0x1e2   :  { %v391_v21 = vmax.f32 %v374_v17, 0.0 }
 0x1e3   :  { %v931_v23 = vpack.c.bf16 %v390_v19, %v388_v18 }
 0x1e4   :  { %v929_v25 = vpack.c.bf16 %v391_v21, %v389_v20 }
 0x1e6   :  { %930 = vmatprep.subr.bf16.mxu0 %v929_v25 }
 0x1e7   :  { %932 = vmatpush1.bf16.msra.mxu0 %v931_v23 }
 0x1e8   :  { %891 = vmatprep.subr.msk.mxu0 %vm94_vm0, %v890_v27 }
 0x1ea   :  { %885 = vmatmul.mubr.msk.f32.vlgmr.msra.gmra.mrb[8].mxu0 %vm412_vm3, %v1241_v29 }
 0x1eb   :  { %495 = vmatprep.mubr.f32.mxu0 %v988_v2  ;;  %892 = vmatpush1.msk.msra.mxu0 %vm94_vm0, %v889_v30 }
 0x1ee   :  { %886 = vmatmul.mubr.msk.f32.gmra.mrb[10].mxu0 %vm412_vm3, %v1253_v31 }
 0x1ef   :  { %501 = vmatprep.mubr.f32.mxu0 %v988_v2 }
 0x1f2   :  { %887 = vmatmul.mubr.msk.f32.gmra.mrb[12].mxu0 %vm412_vm3, %v1262_v32 }
 0x1f3   :  { %507 = vmatprep.mubr.f32.mxu0 %v988_v2 }
 0x1f6   :  { %888 = vmatmul.mubr.msk.f32.gmra.mrb[14].mxu0 %vm412_vm3, %v1270_v34 }
 0x1f7   :  { %595 = vmatprep.mubr.f32.mxu0 %v988_v2 }
 0x1fa   :  { %893 = vmatmul.mubr.msk.f32.vlgmr.msra.gmra.mrb[16].mxu0 %vm81_vm1, %v1044_v3 }
 0x1fb   :  { %601 = vmatprep.mubr.f32.mxu0 %v988_v2 }
 0x1fe   :  { %894 = vmatmul.mubr.msk.f32.gmra.mrb[18].mxu0 %vm81_vm1, %v1059_v7 }
 0x1ff   :  { %607 = vmatprep.mubr.f32.mxu0 %v988_v2 }
 0x202   :  { %895 = vmatmul.mubr.msk.f32.gmra.mrb[20].mxu0 %vm81_vm1, %v1074_v10 }
 0x203   :  { %613 = vmatprep.mubr.f32.mxu0 %v988_v2 }
 0x206   :  { %896 = vmatmul.mubr.msk.f32.gmra.mrb[22].mxu0 %vm81_vm1, %v1088_v13 }
 0x207   :  { %821 = vmatprep.mubr.f32.mxu0 %v988_v2 }
 0x2bd   :  { %v491_v3 = vpop.f32.mrb[8].mxu0 }
 0x2be   :  { %v492_v36 = vadd.f32 %v491_v3, %v1287_v35  ;;  %v493_v37 = vpop.f32.mrb[9].mxu0 }
 0x2bf   :  { %v494_v7 = vadd.f32 %v493_v37, %v1287_v35 }
 0x2c0   :  { %514 = vst [vmem:[#allocation2] sm:$0xff] %v492_v36 }
 0x2c1   :  { %515 = vst [vmem:[#allocation2 + $0x8] sm:$0xff] %v494_v7  ;;  %v497_v10 = vpop.f32.mrb[10].mxu0 }
 0x2c2   :  { %v498_v39 = vadd.f32 %v497_v10, %v1291_v38  ;;  %v499_v40 = vpop.f32.mrb[11].mxu0 }
 0x2c3   :  { %v500_v13 = vadd.f32 %v499_v40, %v1291_v38 }
 0x2c4   :  { %516 = vst [vmem:[#allocation2 + $0x10] sm:$0xff] %v498_v39 }
 0x2c5   :  { %517 = vst [vmem:[#allocation2 + $0x18] sm:$0xff] %v500_v13  ;;  %v503_v43 = vpop.f32.mrb[12].mxu0 }
 0x2c6   :  { %v504_v46 = vadd.f32 %v503_v43, %v1295_v42  ;;  %v505_v47 = vpop.f32.mrb[13].mxu0 }
 0x2c7   :  { %v506_v48 = vadd.f32 %v505_v47, %v1295_v42 }
 0x2c8   :  { %518 = vst [vmem:[#allocation2 + $0x20] sm:$0xff] %v504_v46 }
 0x2c9   :  { %519 = vst [vmem:[#allocation2 + $0x28] sm:$0xff] %v506_v48  ;;  %v509_v50 = vpop.f32.mrb[14].mxu0 }
 0x2ca   :  { %v510_v51 = vadd.f32 %v509_v50, %v1299_v49  ;;  %v511_v52 = vpop.f32.mrb[15].mxu0 }
 0x2cb   :  { %v512_v53 = vadd.f32 %v511_v52, %v1299_v49 }
 0x2cc   :  { %520 = vst [vmem:[#allocation2 + $0x30] sm:$0xff] %v510_v51 }
 0x2cd   :  { %521 = vst [vmem:[#allocation2 + $0x38] sm:$0xff] %v512_v53  ;;  %v597_v54 = vpop.f32.mrb[16].mxu0 }
 0x2ce   :  { %v599_v55 = vpop.f32.mrb[17].mxu0  ;;  %v598_v0 = vadd.f32 %v597_v54, %v1123_v24 }
 0x2cf   :  { %v600_v1 = vadd.f32 %v599_v55, %v1123_v24 }
 0x2d0   :  { %v620_v15 = vmax.f32 %v598_v0, 0.0 }
 0x2d1   :  { %v603_v8 = vpop.f32.mrb[18].mxu0  ;;  %v621_v17 = vmax.f32 %v600_v1, 0.0 }
 0x2d2   :  { %v604_v9 = vadd.f32 %v603_v8, %v1126_v28  ;;  %v605_v12 = vpop.f32.mrb[19].mxu0 }
 0x2d3   :  { %v606_v14 = vadd.f32 %v605_v12, %v1126_v28 }
 0x2d4   :  { %v622_v16 = vmax.f32 %v604_v9, 0.0 }
 0x2d5   :  { %v623_v18 = vmax.f32 %v606_v14, 0.0  ;;  %v609_v19 = vpop.f32.mrb[20].mxu0 }
 0x2d6   :  { %v935_v20 = vpack.c.bf16 %v622_v16, %v620_v15  ;;  %v611_v21 = vpop.f32.mrb[21].mxu0  ;;  %v610_v25 = vadd.f32 %v609_v19, %v1130_v33 }
 0x2d7   :  { %v933_v23 = vpack.c.bf16 %v623_v18, %v621_v17  ;;  %v612_v27 = vadd.f32 %v611_v21, %v1130_v33 }
 0x2d8   :  { %v624_v36 = vmax.f32 %v610_v25, 0.0 }
 0x2d9   :  { %v615_v30 = vpop.f32.mrb[22].mxu0  ;;  %934 = vmatprep.subr.bf16.mxu1 %v933_v23  ;;  %v625_v7 = vmax.f32 %v612_v27, 0.0 }
 0x2da   :  { %v616_v24 = vadd.f32 %v615_v30, %v1134_v44  ;;  %v617_v3 = vpop.f32.mrb[23].mxu0  ;;  %936 = vmatpush1.bf16.msra.mxu1 %v935_v20 }
 0x2db   :  { %v618_v28 = vadd.f32 %v617_v3, %v1134_v44 }
 0x2dc   :  { %v626_v37 = vmax.f32 %v616_v24, 0.0 }
 0x2dd   :  { %v627_v10 = vmax.f32 %v618_v28, 0.0 }
 0x2de   :  { %v939_v39 = vpack.c.bf16 %v626_v37, %v624_v36 }
 0x2df   :  { %v937_v40 = vpack.c.bf16 %v627_v10, %v625_v7 }
 0x2e1   :  { %938 = vmatprep.subr.bf16.mxu1 %v937_v40 }
 0x2e2   :  { %940 = vmatpush1.bf16.msra.mxu1 %v939_v39 }
 0x2e5   :  { %897 = vmatmul.mubr.msk.f32.vlgmr.msra.gmra.mrb[16].mxu1 %vm238_vm2, %v1142_v56 }
 0x2e6   :  { %698 = vmatprep.mubr.f32.mxu1 %v988_v2 }
 0x2e9   :  { %898 = vmatmul.mubr.msk.f32.gmra.mrb[18].mxu1 %vm238_vm2, %v1150_v57 }
 0x2ea   :  { %704 = vmatprep.mubr.f32.mxu1 %v988_v2 }
 0x2ed   :  { %899 = vmatmul.mubr.msk.f32.gmra.mrb[20].mxu1 %vm238_vm2, %v1158_v58 }
 0x2ee   :  { %710 = vmatprep.mubr.f32.mxu1 %v988_v2 }
 0x2f1   :  { %900 = vmatmul.mubr.msk.f32.gmra.mrb[22].mxu1 %vm238_vm2, %v1166_v59 }
 0x2f2   :  { %716 = vmatprep.mubr.f32.mxu1 %v988_v2 }
 0x2f5   :  { %901 = vmatmul.mubr.msk.f32.gmra.mrb[24].mxu1 %vm238_vm2, %v1174_v60 }
 0x2f6   :  { %722 = vmatprep.mubr.f32.mxu1 %v988_v2 }
 0x2f9   :  { %902 = vmatmul.mubr.msk.f32.gmra.mrb[26].mxu1 %vm238_vm2, %v1182_v61 }
 0x2fa   :  { %728 = vmatprep.mubr.f32.mxu1 %v988_v2 }
 0x2fd   :  { %903 = vmatmul.mubr.msk.f32.gmra.mrb[28].mxu1 %vm238_vm2, %v1190_v62 }
 0x2fe   :  { %734 = vmatprep.mubr.f32.mxu1 %v988_v2 }
 0x301   :  { %904 = vmatmul.mubr.msk.f32.gmra.mrb[30].mxu1 %vm238_vm2, %v1198_v63 }
 0x3b8   :  { %v694_v33 = vpop.f32.mrb[16].mxu1 }
 0x3b9   :  { %v696_v44 = vpop.f32.mrb[17].mxu1  ;;  %v695_v56 = vadd.f32 %v694_v33, %v1203_v4 }
 0x3ba   :  { %v697_v57 = vadd.f32 %v696_v44, %v1203_v4 }
 0x3bb   :  { %v741_v13 = vmax.f32 %v695_v56, 0.0 }
 0x3bc   :  { %v700_v58 = vpop.f32.mrb[18].mxu1  ;;  %v742_v62 = vmax.f32 %v697_v57, 0.0 }
 0x3bd   :  { %v701_v59 = vadd.f32 %v700_v58, %v1206_v6  ;;  %v702_v60 = vpop.f32.mrb[19].mxu1 }
 0x3be   :  { %v703_v61 = vadd.f32 %v702_v60, %v1206_v6 }
 0x3bf   :  { %v743_v43 = vmax.f32 %v701_v59, 0.0 }
 0x3c0   :  { %v744_v46 = vmax.f32 %v703_v61, 0.0  ;;  %v706_v47 = vpop.f32.mrb[20].mxu1 }
 0x3c1   :  { %v943_v48 = vpack.c.bf16 %v743_v43, %v741_v13  ;;  %v708_v50 = vpop.f32.mrb[21].mxu1  ;;  %v707_v51 = vadd.f32 %v706_v47, %v1211_v22 }
 0x3c2   :  { %v941_v63 = vpack.c.bf16 %v744_v46, %v742_v62  ;;  %v709_v52 = vadd.f32 %v708_v50, %v1211_v22 }
 0x3c3   :  { %v745_v55 = vmax.f32 %v707_v51, 0.0 }
 0x3c4   :  { %v712_v53 = vpop.f32.mrb[22].mxu1  ;;  %942 = vmatprep.subr.bf16.mxu0 %v941_v63  ;;  %v746_v1 = vmax.f32 %v709_v52, 0.0 }
 0x3c5   :  { %v713_v4 = vadd.f32 %v712_v53, %v1214_v26  ;;  %v714_v54 = vpop.f32.mrb[23].mxu1  ;;  %944 = vmatpush1.bf16.msra.mxu0 %v943_v48 }
 0x3c6   :  { %v715_v6 = vadd.f32 %v714_v54, %v1214_v26 }
 0x3c7   :  { %v747_v0 = vmax.f32 %v713_v4, 0.0 }
 0x3c8   :  { %v748_v8 = vmax.f32 %v715_v6, 0.0  ;;  %v718_v9 = vpop.f32.mrb[24].mxu1 }
 0x3c9   :  { %v947_v12 = vpack.c.bf16 %v747_v0, %v745_v55  ;;  %v720_v14 = vpop.f32.mrb[25].mxu1  ;;  %v719_v16 = vadd.f32 %v718_v9, %v1219_v41 }
 0x3ca   :  { %v945_v15 = vpack.c.bf16 %v748_v8, %v746_v1  ;;  %v721_v22 = vadd.f32 %v720_v14, %v1219_v41 }
 0x3cb   :  { %v749_v20 = vmax.f32 %v719_v16, 0.0 }
 0x3cc   :  { %v724_v17 = vpop.f32.mrb[26].mxu1  ;;  %946 = vmatprep.subr.bf16.mxu0 %v945_v15  ;;  %v750_v23 = vmax.f32 %v721_v22, 0.0 }
 0x3cd   :  { %v725_v18 = vadd.f32 %v724_v17, %v1222_v45  ;;  %v726_v19 = vpop.f32.mrb[27].mxu1  ;;  %948 = vmatpush1.bf16.msra.mxu0 %v947_v12 }
 0x3ce   :  { %v727_v26 = vadd.f32 %v726_v19, %v1222_v45 }
 0x3cf   :  { %v751_v21 = vmax.f32 %v725_v18, 0.0 }
 0x3d0   :  { %v752_v25 = vmax.f32 %v727_v26, 0.0  ;;  %v730_v27 = vpop.f32.mrb[28].mxu1 }
 0x3d1   :  { %v951_v30 = vpack.c.bf16 %v751_v21, %v749_v20  ;;  %v732_v24 = vpop.f32.mrb[29].mxu1  ;;  %v731_v28 = vadd.f32 %v730_v27, %v1227_v5 }
 0x3d2   :  { %v949_v3 = vpack.c.bf16 %v752_v25, %v750_v23  ;;  %v733_v41 = vadd.f32 %v732_v24, %v1227_v5 }
 0x3d3   :  { %v753_v10 = vmax.f32 %v731_v28, 0.0 }
 0x3d4   :  { %v736_v36 = vpop.f32.mrb[30].mxu1  ;;  %950 = vmatprep.subr.bf16.mxu0 %v949_v3  ;;  %v754_v40 = vmax.f32 %v733_v41, 0.0 }
 0x3d5   :  { %v737_v37 = vadd.f32 %v736_v36, %v1230_v11  ;;  %v738_v7 = vpop.f32.mrb[31].mxu1  ;;  %952 = vmatpush1.bf16.msra.mxu0 %v951_v30 }
 0x3d6   :  { %v739_v45 = vadd.f32 %v738_v7, %v1230_v11 }
 0x3d7   :  { %v755_v39 = vmax.f32 %v737_v37, 0.0 }
 0x3d8   :  { %v756_v33 = vmax.f32 %v739_v45, 0.0 }
 0x3d9   :  { %v955_v44 = vpack.c.bf16 %v755_v39, %v753_v10 }
 0x3da   :  { %v953_v56 = vpack.c.bf16 %v756_v33, %v754_v40 }
 0x3dc   :  { %954 = vmatprep.subr.bf16.mxu0 %v953_v56 }
 0x3dd   :  { %956 = vmatpush1.bf16.msra.mxu0 %v955_v44 }
 0x3e0   :  { %905 = vmatmul.mubr.msk.f32.vlgmr.msra.gmra.mrb[24].mxu0 %vm412_vm3, %v1241_v29 }
 0x3e1   :  { %827 = vmatprep.mubr.f32.mxu0 %v988_v2 }
 0x3e4   :  { %906 = vmatmul.mubr.msk.f32.gmra.mrb[26].mxu0 %vm412_vm3, %v1253_v31 }
 0x3e5   :  { %833 = vmatprep.mubr.f32.mxu0 %v988_v2 }
 0x3e8   :  { %907 = vmatmul.mubr.msk.f32.gmra.mrb[28].mxu0 %vm412_vm3, %v1262_v32 }
 0x3e9   :  { %839 = vmatprep.mubr.f32.mxu0 %v988_v2 }
 0x3ec   :  { %908 = vmatmul.mubr.msk.f32.gmra.mrb[30].mxu0 %vm412_vm3, %v1270_v34 }
 0x4b3   :  { %v823_v5 = vpop.f32.mrb[24].mxu0 }
 0x4b4   :  { %v824_v11 = vadd.f32 %v823_v5, %v1287_v35  ;;  %v825_v57 = vpop.f32.mrb[25].mxu0 }
 0x4b5   :  { %v826_v29 = vadd.f32 %v825_v57, %v1287_v35 }
 0x4b6   :  { %847 = vst [vmem:[#allocation2 + $0x40] sm:$0xff] %v824_v11 }
 0x4b7   :  { %848 = vst [vmem:[#allocation2 + $0x48] sm:$0xff] %v826_v29  ;;  %v829_v58 = vpop.f32.mrb[26].mxu0 }
 0x4b8   :  { %v830_v31 = vadd.f32 %v829_v58, %v1291_v38  ;;  %v831_v59 = vpop.f32.mrb[27].mxu0 }
 0x4b9   :  { %v832_v60 = vadd.f32 %v831_v59, %v1291_v38 }
 0x4ba   :  { %849 = vst [vmem:[#allocation2 + $0x50] sm:$0xff] %v830_v31 }
 0x4bb   :  { %850 = vst [vmem:[#allocation2 + $0x58] sm:$0xff] %v832_v60  ;;  %v835_v2 = vpop.f32.mrb[28].mxu0 }
 0x4bc   :  { %v836_v32 = vadd.f32 %v835_v2, %v1295_v42  ;;  %v837_v34 = vpop.f32.mrb[29].mxu0 }
 0x4bd   :  { %v838_v61 = vadd.f32 %v837_v34, %v1295_v42 }
 0x4be   :  { %851 = vst [vmem:[#allocation2 + $0x60] sm:$0xff] %v836_v32 }
 0x4bf   :  { %852 = vst [vmem:[#allocation2 + $0x68] sm:$0xff] %v838_v61  ;;  %v841_v35 = vpop.f32.mrb[30].mxu0 }
 0x4c0   :  { %v842_v13 = vadd.f32 %v841_v35, %v1299_v49  ;;  %v843_v43 = vpop.f32.mrb[31].mxu0 }
 0x4c1   :  { %v844_v62 = vadd.f32 %v843_v43, %v1299_v49 }
 0x4c2   :  { %853 = vst [vmem:[#allocation2 + $0x70] sm:$0xff] %v842_v13 }
 0x4c3   :  { %854 = vst [vmem:[#allocation2 + $0x78] sm:$0xff] %v844_v62 }
 0x4c4   :  { %975 = shalt.err (!%p972_p4)
}
 0x4c5   :  { %s976_s21 = scalar_lea.hbm %s1388_s7, 2048 }
 0x4c6   :  { %p977_p5 = scmp.ne.s32.totalorder %s1388_s7, %s976_s21  ;;  %p980_p6 = scmp.lt.u32.totalorder %s976_s21, %s1388_s7 }
 0x4c8   :  { %p982_p7 = pnand %p980_p6, %p977_p5 }
 0x4ca   :  { %985 = shalt.err (!%p982_p7)
}
 0x4cb   :  { %s991_s25 = smov 256   ;;  %s992_s26 = smov 16  }
 0x4cc   :  { %866 = dma.vmem_to_hbm [thread:$0]  %s861_s19, 2048, %s1388_s7, [#allocation3], %s991_s25, %s991_s25, %s992_s26  }
 0x4cd   :  { %986 = dma.done.wait [#allocation3], 2048  }
 0x4ce   :  { %987 = vsyncadd [#allocation3], 4294965248 }
 0x4cf   :  { %870 = vsyncpa [#allocation3], 1 }

</bundles_post_ra>
